<compile_context>
chip_gen: v6e
topology: v6e:2x2x1
jax: 0.10.0
libtpu: 0.0.40
codegen_flags: <defaults>
</compile_context>

<pallas_src>
import functools

import jax
import jax.numpy as jnp
from jax import lax
from jax.experimental import pallas as pl
from jax.experimental.pallas import tpu as pltpu

EPS = 1e-6
LANES = 128
SUBLANES = 8
STRIP_ROWS = 128            # rows per inner-loop step: 16 (8,128) f32 vregs/operand


def _dice_kernel(x_ref, t_ref, o_ref, *, tile_rows, blocks_per_group,
                 num_valid_elems, any_masked):
    """Accumulate [sum(x*t), sum(x), sum(t)] as (8,128) f32 slabs into o_ref."""
    p = pl.program_id(0)                      # parallel accumulation group
    j = pl.program_id(1)                      # sequential block within the group
    block_elems = tile_rows * LANES
    b = p * blocks_per_group + j              # flat (unclamped) block id
    block_start = b * block_elems             # flat element offset of this block
    # NOTE: int32 scalar math; fine for tensors with < 2**31 elements.

    @pl.when(j == 0)
    def _():
        o_ref[...] = jnp.zeros_like(o_ref)

    n_strips = tile_rows // STRIP_ROWS
    strip_elems = STRIP_ROWS * LANES

    def accumulate(masked):
        if masked:
            # Loop-invariant flat element index within one strip (hoisted).
            strip_iota = (
                lax.broadcasted_iota(jnp.int32, (STRIP_ROWS, LANES), 0) * LANES
                + lax.broadcasted_iota(jnp.int32, (STRIP_ROWS, LANES), 1))

        def body(s, carry):
            a_xt, a_x, a_t = carry
            r0 = pl.multiple_of(s * STRIP_ROWS, STRIP_ROWS)
            # Native-dtype load (bf16 stays bf16 in HBM); convert in-vreg.
            x = x_ref[pl.ds(r0, STRIP_ROWS), :].astype(jnp.float32)
            t = t_ref[pl.ds(r0, STRIP_ROWS), :].astype(jnp.float32)
            if masked:
                remaining = num_valid_elems - (block_start + s * strip_elems)
                valid = strip_iota < remaining
                x = jnp.where(valid, x, 0.0)
                t = jnp.where(valid, t, 0.0)
            # Fold the strip down to (8,128) partials: pure VPU adds (no XLU).
            x3 = x.reshape(STRIP_ROWS // SUBLANES, SUBLANES, LANES)
            t3 = t.reshape(STRIP_ROWS // SUBLANES, SUBLANES, LANES)
            a_xt = a_xt + jnp.sum(x3 * t3, axis=0)
            a_x = a_x + jnp.sum(x3, axis=0)
            a_t = a_t + jnp.sum(t3, axis=0)
            return a_xt, a_x, a_t

        zeros = jnp.zeros((SUBLANES, LANES), jnp.float32)
        a_xt, a_x, a_t = lax.fori_loop(0, n_strips, body, (zeros, zeros, zeros),
                                       unroll=min(8, n_strips))
        o_ref[0, 0] += a_xt
        o_ref[0, 1] += a_x
        o_ref[0, 2] += a_t

    if not any_masked:
        accumulate(False)                     # hot path: no masking anywhere
    else:
        block_end = block_start + block_elems
        pl.when(block_end <= num_valid_elems)(lambda: accumulate(False))
        pl.when(block_end > num_valid_elems)(lambda: accumulate(True))


def _round_up(v, m):
    return (v + m - 1) // m * m


def _per_operand_block_bytes():
    """Per-operand HBM->VMEM block size, chosen per TPU generation."""
    kind = ""
    try:
        kind = jax.devices()[0].device_kind.lower()
    except Exception:
        pass
    if ("v5 lite" in kind) or ("v5lite" in kind) or ("v5e" in kind):
        blk = 2 * 1024 * 1024   # 8 MiB double-buffered: fits v5e 16 MiB scoped default
    elif ("v6" in kind) or ("v7" in kind) or ("7x" in kind):
        blk = 4 * 1024 * 1024   # 16 MiB double-buffered on v6e / v7x
    else:
        blk = 2 * 1024 * 1024   # conservative default for unknown chips
    try:
        # Never let one operand block exceed 1/8 of physical VMEM.
        blk = min(blk, pltpu.get_tpu_info().vmem_capacity_bytes // 8)
    except Exception:
        pass
    return blk


def dice_loss(inp, target, *, block_bytes=None):
    """Pallas implementation of DiceLoss().forward(inp, target) -> scalar f32."""
    assert inp.shape == target.shape
    x = jnp.ravel(inp)
    t = jnp.ravel(target)
    n = x.shape[0]

    rem = n % LANES
    if rem:
        # TODO(synk): rare fallback — lane-tail pad (<128 zeros) still copies the
        # raveled tensors; shapes whose numel is a multiple of 128 skip any copy.
        x = jnp.pad(x, (0, LANES - rem))
        t = jnp.pad(t, (0, LANES - rem))
    rows = x.shape[0] // LANES
    x2 = x.reshape(rows, LANES)
    t2 = t.reshape(rows, LANES)
    num_valid = rows * LANES            # pad zeros are neutral for all three sums

    if block_bytes is None:
        block_bytes = _per_operand_block_bytes()
    itemsize = max(x2.dtype.itemsize, t2.dtype.itemsize)
    tile_rows = max(STRIP_ROWS, block_bytes // (LANES * itemsize))
    tile_rows = (tile_rows // STRIP_ROWS) * STRIP_ROWS
    tile_rows = min(tile_rows, _round_up(rows, STRIP_ROWS))

    num_blocks = -(-rows // tile_rows)
    num_groups = 2 if num_blocks >= 2 else 1        # lets v7x's 2 TCs split the work
    blocks_per_group = -(-num_blocks // num_groups)
    # Masking is needed only for blocks touching / past the end of the array.
    any_masked = num_groups * blocks_per_group * tile_rows > rows

    def in_index_map(p, j):
        # Clamp so duplicate (past-the-end) grid steps re-read the last real
        # block; their contribution is zeroed by the in-kernel mask.
        return (jnp.minimum(p * blocks_per_group + j, num_blocks - 1), 0)

    kernel = functools.partial(
        _dice_kernel,
        tile_rows=tile_rows,
        blocks_per_group=blocks_per_group,
        num_valid_elems=num_valid,
        any_masked=any_masked,
    )

    pipeline_bytes = 2 * tile_rows * LANES * (x2.dtype.itemsize + t2.dtype.itemsize)
    vmem_limit = int(min(48 * 1024 * 1024, pipeline_bytes + 24 * 1024 * 1024))

    partials = pl.pallas_call(
        kernel,
        out_shape=jax.ShapeDtypeStruct((num_groups, 3, SUBLANES, LANES), jnp.float32),
        grid_spec=pltpu.PrefetchScalarGridSpec(
            num_scalar_prefetch=0,
            grid=(num_groups, blocks_per_group),
            in_specs=[
                pl.BlockSpec((tile_rows, LANES), in_index_map),
                pl.BlockSpec((tile_rows, LANES), in_index_map),
            ],
            out_specs=pl.BlockSpec((1, 3, SUBLANES, LANES),
                                   lambda p, j: (p, 0, 0, 0)),
        ),
        compiler_params=pltpu.CompilerParams(
            dimension_semantics=("parallel", "arbitrary"),
            vmem_limit_bytes=vmem_limit,
        ),
        cost_estimate=pl.CostEstimate(
            flops=4 * n,
            transcendentals=0,
            bytes_accessed=n * (x2.dtype.itemsize + t2.dtype.itemsize),
        ),
    )(x2, t2)

    intersection = jnp.sum(partials[:, 0])
    denom = jnp.sum(partials[:, 1]) + jnp.sum(partials[:, 2]) + EPS
    # forward() returns 1 - dice = (2*I + eps) / (sum_in + sum_tgt + eps)
    return (2.0 * intersection + EPS) / denom


def _ref_dice(inp, target):
    inp = inp.astype(jnp.float32)
    target = target.astype(jnp.float32)
    inter = jnp.sum(inp * target)
    return (2.0 * inter + EPS) / (jnp.sum(inp) + jnp.sum(target) + EPS)


if __name__ == "__main__":
    key = jax.random.PRNGKey(0)
    k1, k2, k3, k4, k5, k6 = jax.random.split(key, 6)

    # 1) Segmentation-style NCHW = (2, 4, 16, 16): single block, masked tail rows.
    inp = jax.nn.sigmoid(jax.random.normal(k1, (2, 4, 16, 16), dtype=jnp.float32))
    tgt = (jax.random.uniform(k2, (2, 4, 16, 16)) > 0.5).astype(jnp.float32)
    loss = jax.block_until_ready(dice_loss(inp, tgt))
    ref = _ref_dice(inp, tgt)
    assert jnp.allclose(loss, ref, rtol=1e-5, atol=1e-6), (loss, ref)

    # 2) Multi-block + 2 parallel accumulation groups (small block_bytes override
    #    exercises the 2-D grid and cross-block accumulation at small size):
    #    rows = 1536 -> 12 blocks of 128 rows split over 2 groups, no masking.
    inp2 = jax.nn.sigmoid(jax.random.normal(k3, (4, 4, 96, 128), dtype=jnp.float32))
    tgt2 = (jax.random.uniform(k4, (4, 4, 96, 128)) > 0.5).astype(jnp.float32)
    loss2 = jax.block_until_ready(dice_loss(inp2, tgt2, block_bytes=64 * 1024))
    ref2 = _ref_dice(inp2, tgt2)
    assert jnp.allclose(loss2, ref2, rtol=1e-5, atol=1e-6), (loss2, ref2)

    # 3) Odd element count (lane-pad fallback + element mask) with a bf16 input
    #    (native-dtype load, in-vreg f32 conversion).
    inp3 = jax.nn.sigmoid(
        jax.random.normal(k5, (3, 5, 17, 19), dtype=jnp.float32)).astype(jnp.bfloat16)
    tgt3 = (jax.random.uniform(k6, (3, 5, 17, 19)) > 0.5).astype(jnp.float32)
    loss3 = jax.block_until_ready(dice_loss(inp3, tgt3))
    ref3 = _ref_dice(inp3, tgt3)
    assert jnp.allclose(loss3, ref3, rtol=1e-4, atol=1e-5), (loss3, ref3)

    print("KERNEL_OK")
</pallas_src>

<mosaic_0001>
module attributes {stable_mosaic.version = 11 : i64} {
  func.func @_dice_kernel(%arg0: i32, %arg1: i32, %arg2: memref<128x128xf32, #tpu.memory_space<vmem>>, %arg3: memref<128x128xf32, #tpu.memory_space<vmem>>, %arg4: memref<1x3x8x128xf32, #tpu.memory_space<vmem>>) attributes {dimension_semantics = [#tpu.dimension_semantics<parallel>, #tpu.dimension_semantics<arbitrary>], iteration_bounds = array<i64: 1, 1>, scalar_prefetch = 0 : i64, scratch_operands = 0 : i64, tpu.core_type = #tpu.core_type<tc>, window_params = [{transform_indices = @transform_0, window_bounds = array<i64: 128, 128>}, {transform_indices = @transform_1, window_bounds = array<i64: 128, 128>}, {transform_indices = @transform_2, window_bounds = array<i64: 1, 3, 8, 128>}]} {
    %c1_i32 = arith.constant 1 : i32
    %0 = arith.muli %arg0, %c1_i32 : i32
    %1 = arith.addi %0, %arg1 : i32
    %c16384_i32 = arith.constant 16384 : i32
    %2 = arith.muli %1, %c16384_i32 : i32
    %c0_i32 = arith.constant 0 : i32
    %3 = arith.cmpi eq, %arg1, %c0_i32 : i32
    %4 = arith.extui %3 : i1 to i32
    %c0_i32_0 = arith.constant 0 : i32
    %5 = arith.cmpi ne, %4, %c0_i32_0 : i32
    scf.if %5 {
      %cst = arith.constant 0.000000e+00 : f32
      %13 = vector.broadcast %cst : f32 to vector<1x3x8x128xf32>
      %c0 = arith.constant 0 : index
      %c0_5 = arith.constant 0 : index
      %c0_6 = arith.constant 0 : index
      %c0_7 = arith.constant 0 : index
      %14 = vector.load %arg4[%c0, %c0_5, %c0_6, %c0_7] : memref<1x3x8x128xf32, #tpu.memory_space<vmem>>, vector<1x3x8x128xf32>
      tpu.vector_store %arg4[%c0, %c0_5, %c0_6, %c0_7], %13 {strides = array<i32>} : memref<1x3x8x128xf32, #tpu.memory_space<vmem>>, vector<1x3x8x128xf32>,
    } else {
    }
    %c16384_i32_1 = arith.constant 16384 : i32
    %6 = arith.addi %2, %c16384_i32_1 : i32
    %c2048_i32 = arith.constant 2048 : i32
    %7 = arith.cmpi sle, %6, %c2048_i32 : i32
    %8 = arith.extui %7 : i1 to i32
    %c0_i32_2 = arith.constant 0 : i32
    %9 = arith.cmpi ne, %8, %c0_i32_2 : i32
    scf.if %9 {
      %cst = arith.constant 0.000000e+00 : f32
      %13 = vector.broadcast %cst : f32 to vector<8x128xf32>
      %c0_i32_5 = arith.constant 0 : i32
      %c128_i32 = arith.constant 128 : i32
      %14 = arith.muli %c0_i32_5, %c128_i32 : i32
      %15 = tpu.assume_multiple %14, 128 : i32
      %16 = arith.index_cast %15 : i32 to index
      %c0 = arith.constant 0 : index
      %17 = vector.load %arg2[%16, %c0] : memref<128x128xf32, #tpu.memory_space<vmem>>, vector<128x128xf32>
      %18 = arith.index_cast %15 : i32 to index
      %c0_6 = arith.constant 0 : index
      %19 = vector.load %arg3[%18, %c0_6] : memref<128x128xf32, #tpu.memory_space<vmem>>, vector<128x128xf32>
      %20 = vector.shape_cast %17 : vector<128x128xf32> to vector<16x8x128xf32>
      %21 = vector.shape_cast %19 : vector<128x128xf32> to vector<16x8x128xf32>
      %22 = arith.mulf %20, %21 : vector<16x8x128xf32>
      %cst_7 = arith.constant dense<0.000000e+00> : vector<8x128xf32>
      %23 = vector.multi_reduction <add>, %22, %cst_7 [0] : vector<16x8x128xf32> to vector<8x128xf32>
      %24 = arith.addf %13, %23 : vector<8x128xf32>
      %cst_8 = arith.constant dense<0.000000e+00> : vector<8x128xf32>
      %25 = vector.multi_reduction <add>, %20, %cst_8 [0] : vector<16x8x128xf32> to vector<8x128xf32>
      %26 = arith.addf %13, %25 : vector<8x128xf32>
      %cst_9 = arith.constant dense<0.000000e+00> : vector<8x128xf32>
      %27 = vector.multi_reduction <add>, %21, %cst_9 [0] : vector<16x8x128xf32> to vector<8x128xf32>
      %28 = arith.addf %13, %27 : vector<8x128xf32>
      %c1_i32_10 = arith.constant 1 : i32
      %c0_11 = arith.constant 0 : index
      %c0_12 = arith.constant 0 : index
      %c0_13 = arith.constant 0 : index
      %c0_14 = arith.constant 0 : index
      %29 = vector.load %arg4[%c0_11, %c0_12, %c0_13, %c0_14] : memref<1x3x8x128xf32, #tpu.memory_space<vmem>>, vector<1x1x8x128xf32>
      %30 = vector.shape_cast %29 : vector<1x1x8x128xf32> to vector<8x128xf32>
      %31 = arith.addf %30, %24 : vector<8x128xf32>
      %c0_15 = arith.constant 0 : index
      %c0_16 = arith.constant 0 : index
      %c0_17 = arith.constant 0 : index
      %c0_18 = arith.constant 0 : index
      %32 = vector.load %arg4[%c0_15, %c0_16, %c0_17, %c0_18] : memref<1x3x8x128xf32, #tpu.memory_space<vmem>>, vector<1x1x8x128xf32>
      %33 = vector.shape_cast %32 : vector<1x1x8x128xf32> to vector<8x128xf32>
      %34 = vector.shape_cast %31 : vector<8x128xf32> to vector<1x1x8x128xf32>
      tpu.vector_store %arg4[%c0_15, %c0_16, %c0_17, %c0_18], %34 {strides = array<i32>} : memref<1x3x8x128xf32, #tpu.memory_space<vmem>>, vector<1x1x8x128xf32>,
      %c0_19 = arith.constant 0 : index
      %c1 = arith.constant 1 : index
      %c0_20 = arith.constant 0 : index
      %c0_21 = arith.constant 0 : index
      %35 = vector.load %arg4[%c0_19, %c1, %c0_20, %c0_21] : memref<1x3x8x128xf32, #tpu.memory_space<vmem>>, vector<1x1x8x128xf32>
      %36 = vector.shape_cast %35 : vector<1x1x8x128xf32> to vector<8x128xf32>
      %37 = arith.addf %36, %26 : vector<8x128xf32>
      %c0_22 = arith.constant 0 : index
      %c1_23 = arith.constant 1 : index
      %c0_24 = arith.constant 0 : index
      %c0_25 = arith.constant 0 : index
      %38 = vector.load %arg4[%c0_22, %c1_23, %c0_24, %c0_25] : memref<1x3x8x128xf32, #tpu.memory_space<vmem>>, vector<1x1x8x128xf32>
      %39 = vector.shape_cast %38 : vector<1x1x8x128xf32> to vector<8x128xf32>
      %40 = vector.shape_cast %37 : vector<8x128xf32> to vector<1x1x8x128xf32>
      tpu.vector_store %arg4[%c0_22, %c1_23, %c0_24, %c0_25], %40 {strides = array<i32>} : memref<1x3x8x128xf32, #tpu.memory_space<vmem>>, vector<1x1x8x128xf32>,
      %c0_26 = arith.constant 0 : index
      %c2 = arith.constant 2 : index
      %c0_27 = arith.constant 0 : index
      %c0_28 = arith.constant 0 : index
      %41 = vector.load %arg4[%c0_26, %c2, %c0_27, %c0_28] : memref<1x3x8x128xf32, #tpu.memory_space<vmem>>, vector<1x1x8x128xf32>
      %42 = vector.shape_cast %41 : vector<1x1x8x128xf32> to vector<8x128xf32>
      %43 = arith.addf %42, %28 : vector<8x128xf32>
      %c0_29 = arith.constant 0 : index
      %c2_30 = arith.constant 2 : index
      %c0_31 = arith.constant 0 : index
      %c0_32 = arith.constant 0 : index
      %44 = vector.load %arg4[%c0_29, %c2_30, %c0_31, %c0_32] : memref<1x3x8x128xf32, #tpu.memory_space<vmem>>, vector<1x1x8x128xf32>
      %45 = vector.shape_cast %44 : vector<1x1x8x128xf32> to vector<8x128xf32>
      %46 = vector.shape_cast %43 : vector<8x128xf32> to vector<1x1x8x128xf32>
      tpu.vector_store %arg4[%c0_29, %c2_30, %c0_31, %c0_32], %46 {strides = array<i32>} : memref<1x3x8x128xf32, #tpu.memory_space<vmem>>, vector<1x1x8x128xf32>,
    } else {
    }
    %c2048_i32_3 = arith.constant 2048 : i32
    %10 = arith.cmpi sgt, %6, %c2048_i32_3 : i32
    %11 = arith.extui %10 : i1 to i32
    %c0_i32_4 = arith.constant 0 : i32
    %12 = arith.cmpi ne, %11, %c0_i32_4 : i32
    scf.if %12 {
      %13 = tpu.iota {dimensions = array<i32: 0>} : vector<128x128xi32>
      %c128_i32 = arith.constant 128 : i32
      %14 = vector.broadcast %c128_i32 : i32 to vector<128x128xi32>
      %15 = arith.muli %13, %14 : vector<128x128xi32>
      %16 = tpu.iota {dimensions = array<i32: 1>} : vector<128x128xi32>
      %17 = arith.addi %15, %16 : vector<128x128xi32>
      %cst = arith.constant 0.000000e+00 : f32
      %18 = vector.broadcast %cst : f32 to vector<8x128xf32>
      %c0_i32_5 = arith.constant 0 : i32
      %c128_i32_6 = arith.constant 128 : i32
      %19 = arith.muli %c0_i32_5, %c128_i32_6 : i32
      %20 = tpu.assume_multiple %19, 128 : i32
      %21 = arith.index_cast %20 : i32 to index
      %c0 = arith.constant 0 : index
      %22 = vector.load %arg2[%21, %c0] : memref<128x128xf32, #tpu.memory_space<vmem>>, vector<128x128xf32>
      %23 = arith.index_cast %20 : i32 to index
      %c0_7 = arith.constant 0 : index
      %24 = vector.load %arg3[%23, %c0_7] : memref<128x128xf32, #tpu.memory_space<vmem>>, vector<128x128xf32>
      %c16384_i32_8 = arith.constant 16384 : i32
      %25 = arith.muli %c0_i32_5, %c16384_i32_8 : i32
      %26 = arith.addi %2, %25 : i32
      %c2048_i32_9 = arith.constant 2048 : i32
      %27 = arith.subi %c2048_i32_9, %26 : i32
      %28 = vector.broadcast %27 : i32 to vector<128x128xi32>
      %29 = arith.cmpi slt, %17, %28 : vector<128x128xi32>
      %cst_10 = arith.constant 0.000000e+00 : f32
      %30 = vector.broadcast %cst_10 : f32 to vector<128x128xf32>
      %31 = arith.select %29, %22, %30 : vector<128x128xi1>, vector<128x128xf32>
      %cst_11 = arith.constant 0.000000e+00 : f32
      %32 = vector.broadcast %cst_11 : f32 to vector<128x128xf32>
      %33 = arith.select %29, %24, %32 : vector<128x128xi1>, vector<128x128xf32>
      %34 = vector.shape_cast %31 : vector<128x128xf32> to vector<16x8x128xf32>
      %35 = vector.shape_cast %33 : vector<128x128xf32> to vector<16x8x128xf32>
      %36 = arith.mulf %34, %35 : vector<16x8x128xf32>
      %cst_12 = arith.constant dense<0.000000e+00> : vector<8x128xf32>
      %37 = vector.multi_reduction <add>, %36, %cst_12 [0] : vector<16x8x128xf32> to vector<8x128xf32>
      %38 = arith.addf %18, %37 : vector<8x128xf32>
      %cst_13 = arith.constant dense<0.000000e+00> : vector<8x128xf32>
      %39 = vector.multi_reduction <add>, %34, %cst_13 [0] : vector<16x8x128xf32> to vector<8x128xf32>
      %40 = arith.addf %18, %39 : vector<8x128xf32>
      %cst_14 = arith.constant dense<0.000000e+00> : vector<8x128xf32>
      %41 = vector.multi_reduction <add>, %35, %cst_14 [0] : vector<16x8x128xf32> to vector<8x128xf32>
      %42 = arith.addf %18, %41 : vector<8x128xf32>
      %c1_i32_15 = arith.constant 1 : i32
      %c0_16 = arith.constant 0 : index
      %c0_17 = arith.constant 0 : index
      %c0_18 = arith.constant 0 : index
      %c0_19 = arith.constant 0 : index
      %43 = vector.load %arg4[%c0_16, %c0_17, %c0_18, %c0_19] : memref<1x3x8x128xf32, #tpu.memory_space<vmem>>, vector<1x1x8x128xf32>
      %44 = vector.shape_cast %43 : vector<1x1x8x128xf32> to vector<8x128xf32>
      %45 = arith.addf %44, %38 : vector<8x128xf32>
      %c0_20 = arith.constant 0 : index
      %c0_21 = arith.constant 0 : index
      %c0_22 = arith.constant 0 : index
      %c0_23 = arith.constant 0 : index
      %46 = vector.load %arg4[%c0_20, %c0_21, %c0_22, %c0_23] : memref<1x3x8x128xf32, #tpu.memory_space<vmem>>, vector<1x1x8x128xf32>
      %47 = vector.shape_cast %46 : vector<1x1x8x128xf32> to vector<8x128xf32>
      %48 = vector.shape_cast %45 : vector<8x128xf32> to vector<1x1x8x128xf32>
      tpu.vector_store %arg4[%c0_20, %c0_21, %c0_22, %c0_23], %48 {strides = array<i32>} : memref<1x3x8x128xf32, #tpu.memory_space<vmem>>, vector<1x1x8x128xf32>,
      %c0_24 = arith.constant 0 : index
      %c1 = arith.constant 1 : index
      %c0_25 = arith.constant 0 : index
      %c0_26 = arith.constant 0 : index
      %49 = vector.load %arg4[%c0_24, %c1, %c0_25, %c0_26] : memref<1x3x8x128xf32, #tpu.memory_space<vmem>>, vector<1x1x8x128xf32>
      %50 = vector.shape_cast %49 : vector<1x1x8x128xf32> to vector<8x128xf32>
      %51 = arith.addf %50, %40 : vector<8x128xf32>
      %c0_27 = arith.constant 0 : index
      %c1_28 = arith.constant 1 : index
      %c0_29 = arith.constant 0 : index
      %c0_30 = arith.constant 0 : index
      %52 = vector.load %arg4[%c0_27, %c1_28, %c0_29, %c0_30] : memref<1x3x8x128xf32, #tpu.memory_space<vmem>>, vector<1x1x8x128xf32>
      %53 = vector.shape_cast %52 : vector<1x1x8x128xf32> to vector<8x128xf32>
      %54 = vector.shape_cast %51 : vector<8x128xf32> to vector<1x1x8x128xf32>
      tpu.vector_store %arg4[%c0_27, %c1_28, %c0_29, %c0_30], %54 {strides = array<i32>} : memref<1x3x8x128xf32, #tpu.memory_space<vmem>>, vector<1x1x8x128xf32>,
      %c0_31 = arith.constant 0 : index
      %c2 = arith.constant 2 : index
      %c0_32 = arith.constant 0 : index
      %c0_33 = arith.constant 0 : index
      %55 = vector.load %arg4[%c0_31, %c2, %c0_32, %c0_33] : memref<1x3x8x128xf32, #tpu.memory_space<vmem>>, vector<1x1x8x128xf32>
      %56 = vector.shape_cast %55 : vector<1x1x8x128xf32> to vector<8x128xf32>
      %57 = arith.addf %56, %42 : vector<8x128xf32>
      %c0_34 = arith.constant 0 : index
      %c2_35 = arith.constant 2 : index
      %c0_36 = arith.constant 0 : index
      %c0_37 = arith.constant 0 : index
      %58 = vector.load %arg4[%c0_34, %c2_35, %c0_36, %c0_37] : memref<1x3x8x128xf32, #tpu.memory_space<vmem>>, vector<1x1x8x128xf32>
      %59 = vector.shape_cast %58 : vector<1x1x8x128xf32> to vector<8x128xf32>
      %60 = vector.shape_cast %57 : vector<8x128xf32> to vector<1x1x8x128xf32>
      tpu.vector_store %arg4[%c0_34, %c2_35, %c0_36, %c0_37], %60 {strides = array<i32>} : memref<1x3x8x128xf32, #tpu.memory_space<vmem>>, vector<1x1x8x128xf32>,
    } else {
    }
    return
  }
  func.func @transform_0(%arg0: i32, %arg1: i32) -> (i32, i32) {
    %c1_i32 = arith.constant 1 : i32
    %0 = arith.muli %arg0, %c1_i32 : i32
    %1 = arith.addi %0, %arg1 : i32
    %c0_i32 = arith.constant 0 : i32
    %2 = arith.minsi %1, %c0_i32 : i32
    %c0_i32_0 = arith.constant 0 : i32
    %c0_i32_1 = arith.constant 0 : i32
    return %2, %c0_i32_0 : i32, i32
  }
  func.func @transform_1(%arg0: i32, %arg1: i32) -> (i32, i32) {
    %c1_i32 = arith.constant 1 : i32
    %0 = arith.muli %arg0, %c1_i32 : i32
    %1 = arith.addi %0, %arg1 : i32
    %c0_i32 = arith.constant 0 : i32
    %2 = arith.minsi %1, %c0_i32 : i32
    %c0_i32_0 = arith.constant 0 : i32
    %c0_i32_1 = arith.constant 0 : i32
    return %2, %c0_i32_0 : i32, i32
  }
  func.func @transform_2(%arg0: i32, %arg1: i32) -> (i32, i32, i32, i32) {
    %c0_i32 = arith.constant 0 : i32
    %c0_i32_0 = arith.constant 0 : i32
    %c0_i32_1 = arith.constant 0 : i32
    %c0_i32_2 = arith.constant 0 : i32
    return %arg0, %c0_i32, %c0_i32_0, %c0_i32_1 : i32, i32, i32, i32
  }
}

</mosaic_0001>

<bundles_post_ra>
// kernel: tpu_custom_call.1
= control target key start
LH: loop header
LB: loop body
LE: loop exit
PB: predicated region body
PF: predicated region fallthrough
CT: control target
= control target key end

     0   :  { %7 = vsyncpa [#allocation3], 0  ;;  %s584_s0 = inlined_call_operand.hbm [shape: f32[16,128], index: 0, kind: input, shape index: {}]   ;;  %s585_s1 = inlined_call_operand.hbm [shape: f32[16,128], index: 1, kind: input, shape index: {}]   ;;  %s586_s2 = inlined_call_operand.hbm [shape: f32[1,3,8,128], index: 2, kind: output, shape index: {}]  }
   0x1   :  { %8 = vsyncpa [#allocation6], 0 }
   0x2   :  { %9 = vsyncpa [#allocation4], 0 }
   0x3   :  { %20 = vsyncadd [#allocation3], 1792  ;;  %s499_s9 = smov [#allocation2]  }
   0x4   :  { %s25_s10 = sshll.u32 %s499_s9, 4  ;;  %s26_s10 = int_to_ptr.vmem [resolvable:$true] %s25_s10 }
   0x5   :  { %s441_s11 = scalar_lea.vmem %s26_s10, 256  ;;  %s445_s12 = scalar_lea.vmem %s26_s10, 2048 }
   0x6   :  { %p442_p0 = scmp.ne.s32.totalorder %s26_s10, %s441_s11  ;;  %p446_p1 = scmp.lt.s32.totalorder %s26_s10, %s26_s10 }
   0x7   :  { %p447_p2 = scmp.lt.s32.totalorder %s445_s12, %s441_s11 }
   0x9   :  { %p448_p3 = por %p447_p2, %p446_p1 }
   0xb   :  { %p449_p4 = pnand %p448_p3, %p442_p0 }
   0xd   :  { %452 = shalt.err (!%p449_p4)
}
   0xe   :  { %s500_s13 = smov 128   ;;  %s501_s14 = smov 8  }
   0xf   :  { %31 = dma.hbm_to_vmem [thread:$0]  %s584_s0, 256, %s26_s10, [#allocation3], %s500_s13, %s500_s13, %s501_s14  }
  0x10   :  { %42 = vsyncadd [#allocation6], 1792  ;;  %s502_s17 = smov [#allocation5]  }
  0x11   :  { %s47_s18 = sshll.u32 %s502_s17, 4  ;;  %s48_s18 = int_to_ptr.vmem [resolvable:$true] %s47_s18 }
  0x12   :  { %s461_s19 = scalar_lea.vmem %s48_s18, 256  ;;  %s465_s20 = scalar_lea.vmem %s48_s18, 2048 }
  0x13   :  { %p462_p5 = scmp.ne.s32.totalorder %s48_s18, %s461_s19  ;;  %p466_p6 = scmp.lt.s32.totalorder %s48_s18, %s48_s18 }
  0x14   :  { %p467_p7 = scmp.lt.s32.totalorder %s465_s20, %s461_s19 }
  0x16   :  { %p468_p8 = por %p467_p7, %p466_p6 }
  0x18   :  { %p469_p9 = pnand %p468_p8, %p462_p5 }
  0x1a   :  { %472 = shalt.err (!%p469_p9)
}
  0x1b   :  { %53 = dma.hbm_to_vmem [thread:$0]  %s585_s1, 256, %s48_s18, [#allocation6], %s500_s13, %s500_s13, %s501_s14  }
  0x1c   :  { %493 = dma.done.wait [#allocation3], 2048  }
  0x1d   :  { %494 = vsyncadd [#allocation3], 4294965248 }
  0x1e   :  { %495 = dma.done.wait [#allocation6], 2048  }
  0x1f   :  { %496 = vsyncadd [#allocation6], 4294965248  ;;  %v197_v0 = vlaneseq  ;;  %v248_v22 = vld [vmem:[#allocation2] sm:$0xff]  ;;  %v249_v25 = vld [vmem:[#allocation2 + $0x8] sm:$0xff]  ;;  %s503_s0 = smov [#allocation7]  }
  0x20   :  { %v264_v26 = vld [vmem:[#allocation5] sm:$0xff]  ;;  %v265_v27 = vld [vmem:[#allocation5 + $0x8] sm:$0xff]  ;;  %v250_v35 = vld [vmem:[#allocation2 + $0x10] sm:$0xff]  ;;  %s410_s1 = sshll.u32 %s503_s0, 4  ;;  %s411_s1 = int_to_ptr.vmem [resolvable:$true] %s410_s1 }
  0x21   :  { %v198_v1 = vshrl.u32 %v197_v0, 7  ;;  %v531_v7 = vand.u32 127, %v197_v0  ;;  %v266_v36 = vld [vmem:[#allocation5 + $0x10] sm:$0xff]  ;;  %v251_v44 = vld [vmem:[#allocation2 + $0x18] sm:$0xff]  ;;  %v252_v51 = vld [vmem:[#allocation2 + $0x20] sm:$0xff]  ;;  %s473_s23 = scalar_lea.vmem %s411_s1, 384  ;;  %p478_p11 = scmp.lt.s32.totalorder %s411_s1, %s411_s1 }
  0x22   :  { %v267_v45 = vld [vmem:[#allocation5 + $0x18] sm:$0xff]  ;;  %v268_v52 = vld [vmem:[#allocation5 + $0x20] sm:$0xff]  ;;  %v253_v61 = vld [vmem:[#allocation2 + $0x28] sm:$0xff]  ;;  %p474_p10 = scmp.ne.s32.totalorder %s411_s1, %s473_s23  ;;  %p479_p12 = scmp.lt.s32.totalorder %s473_s23, %s473_s23 }
  0x23   :  { %v199_v2 = vadd.s32 8, %v198_v1  ;;  %v200_v3 = vadd.s32 16, %v198_v1  ;;  %v201_v4 = vadd.s32 24, %v198_v1  ;;  %v214_v5 = vmul.u32 128, %v198_v1  ;;  %v269_v62 = vld [vmem:[#allocation5 + $0x28] sm:$0xff] }
  0x24   :  { %v202_v8 = vadd.s32 32, %v198_v1  ;;  %v203_v10 = vadd.s32 40, %v198_v1  ;;  %v204_v14 = vadd.s32 48, %v198_v1  ;;  %v205_v15 = vadd.s32 56, %v198_v1  ;;  %p480_p13 = por %p479_p12, %p478_p11 }
  0x25   :  { %v215_v6 = vmul.u32 128, %v199_v2  ;;  %v216_v9 = vmul.u32 128, %v200_v3  ;;  %v232_v12 = vadd.s32 %v531_v7, %v214_v5  ;;  %v206_v18 = vadd.s32 64, %v198_v1  ;;  %v270_v5 = vld [vmem:[#allocation5 + $0x30] sm:$0xff] }
  0x26   :  { %v217_v11 = vmul.u32 128, %v201_v4  ;;  %v218_v16 = vmul.u32 128, %v202_v8  ;;  %v207_v19 = vadd.s32 72, %v198_v1  ;;  %v208_v20 = vadd.s32 80, %v198_v1  ;;  %v254_v4 = vld [vmem:[#allocation2 + $0x30] sm:$0xff]  ;;  %p481_p0 = pnand %p480_p13, %p474_p10 }
  0x27   :  { %v233_v13 = vadd.s32 %v531_v7, %v215_v6  ;;  %v234_v17 = vadd.s32 %v531_v7, %v216_v9  ;;  %v536_v21 = vadd.s32 88, %v198_v1  ;;  %v219_v23 = vmul.u32 128, %v203_v10 }
  0x28   :  { %v235_v24 = vadd.s32 %v531_v7, %v217_v11  ;;  %vm282_vm0 = vcmp.lt.s32.totalorder %v232_v12, 2048  ;;  %v539_v28 = vadd.s32 96, %v198_v1  ;;  %v541_v29 = vadd.s32 104, %v198_v1 }
  0x29   :  { %vm283_vm1 = vcmp.lt.s32.totalorder %v233_v13, 2048  ;;  %v543_v30 = vadd.s32 112, %v198_v1  ;;  %v220_v31 = vmul.u32 128, %v204_v14  ;;  %v545_v32 = vadd.s32 120, %v198_v1  ;;  %v255_v14 = vld [vmem:[#allocation2 + $0x38] sm:$0xff] }
  0x2a   :  { %v221_v33 = vmul.u32 128, %v205_v15  ;;  %v236_v34 = vadd.s32 %v531_v7, %v218_v16  ;;  %vm284_vm2 = vcmp.lt.s32.totalorder %v234_v17, 2048  ;;  %v298_v37 = vsel %vm282_vm0, %v248_v22, 0.0  ;;  %v271_v15 = vld [vmem:[#allocation5 + $0x38] sm:$0xff] }
  0x2b   :  { %v299_v38 = vsel %vm283_vm1, %v249_v25, 0.0  ;;  %v314_v39 = vsel %vm282_vm0, %v264_v26, 0.0  ;;  %v315_v40 = vsel %vm283_vm1, %v265_v27, 0.0  ;;  %v222_v41 = vmul.u32 128, %v206_v18 }
  0x2c   :  { %v223_v42 = vmul.u32 128, %v207_v19  ;;  %v237_v43 = vadd.s32 %v531_v7, %v219_v23  ;;  %vm285_vm3 = vcmp.lt.s32.totalorder %v235_v24, 2048  ;;  %v224_v46 = vmul.u32 128, %v208_v20  ;;  %v256_v23 = vld [vmem:[#allocation2 + $0x40] sm:$0xff] }
  0x2d   :  { %v238_v47 = vadd.s32 %v531_v7, %v220_v31  ;;  %v300_v48 = vsel %vm284_vm2, %v250_v35, 0.0  ;;  %v316_v49 = vsel %vm284_vm2, %v266_v36, 0.0  ;;  %v225_v50 = vmul.u32 128, %v536_v21  ;;  %v272_v24 = vld [vmem:[#allocation5 + $0x40] sm:$0xff] }
  0x2e   :  { %vm286_vm4 = vcmp.lt.s32.totalorder %v236_v34, 2048  ;;  %v330_v53 = vmul.f32 %v314_v39, %v298_v37  ;;  %v331_v54 = vmul.f32 %v315_v40, %v299_v38  ;;  %v226_v55 = vmul.u32 128, %v539_v28 }
  0x2f   :  { %v239_v56 = vadd.s32 %v531_v7, %v221_v33  ;;  %v301_v57 = vsel %vm285_vm3, %v251_v44, 0.0  ;;  %v317_v58 = vsel %vm285_vm3, %v267_v45, 0.0  ;;  %v227_v59 = vmul.u32 128, %v541_v29  ;;  %v257_v33 = vld [vmem:[#allocation2 + $0x48] sm:$0xff] }
  0x30   :  { %v240_v60 = vadd.s32 %v531_v7, %v222_v41  ;;  %vm287_vm5 = vcmp.lt.s32.totalorder %v237_v43, 2048  ;;  %v332_v63 = vmul.f32 %v316_v49, %v300_v48  ;;  %v228_v0 = vmul.u32 128, %v543_v30  ;;  %v258_v41 = vld [vmem:[#allocation2 + $0x50] sm:$0xff] }
  0x31   :  { %v241_v1 = vadd.s32 %v531_v7, %v223_v42  ;;  %v302_v2 = vsel %vm286_vm4, %v252_v51, 0.0  ;;  %v318_v3 = vsel %vm286_vm4, %v268_v52, 0.0  ;;  %vm288_vm6 = vcmp.lt.s32.totalorder %v238_v47, 2048  ;;  %v274_v42 = vld [vmem:[#allocation5 + $0x50] sm:$0xff]  ;;  %v275_v51 = vld [vmem:[#allocation5 + $0x58] sm:$0xff] }
  0x32   :  { %v333_v6 = vmul.f32 %v317_v58, %v301_v57  ;;  %v346_v8 = vadd.f32 %v331_v54, %v330_v53  ;;  %v362_v9 = vadd.f32 %v299_v38, %v298_v37  ;;  %v242_v10 = vadd.s32 %v531_v7, %v224_v46 }
  0x33   :  { %v303_v11 = vsel %vm287_vm5, %v253_v61, 0.0  ;;  %v319_v12 = vsel %vm287_vm5, %v269_v62, 0.0  ;;  %v378_v13 = vadd.f32 %v315_v40, %v314_v39  ;;  %vm289_vm7 = vcmp.lt.s32.totalorder %v239_v56, 2048 }
  0x34   :  { %v334_v16 = vmul.f32 %v318_v3, %v302_v2  ;;  %v347_v17 = vadd.f32 %v346_v8, %v332_v63  ;;  %v363_v18 = vadd.f32 %v362_v9, %v300_v48  ;;  %v229_v19 = vmul.u32 128, %v545_v32  ;;  %v273_v32 = vld [vmem:[#allocation5 + $0x48] sm:$0xff] }
  0x35   :  { %v304_v20 = vsel %vm288_vm6, %v254_v4, 0.0  ;;  %v320_v21 = vsel %vm288_vm6, %v270_v5, 0.0  ;;  %v379_v22 = vadd.f32 %v378_v13, %v316_v49  ;;  %vm290_vm8 = vcmp.lt.s32.totalorder %v240_v60, 2048  ;;  %v260_v60 = vld [vmem:[#allocation2 + $0x60] sm:$0xff]  ;;  %v261_v5 = vld [vmem:[#allocation2 + $0x68] sm:$0xff]  ;;  %v262_v13 = vld [vmem:[#allocation2 + $0x70] sm:$0xff] }
  0x36   :  { %v335_v25 = vmul.f32 %v319_v12, %v303_v11  ;;  %v348_v26 = vadd.f32 %v347_v17, %v333_v6  ;;  %v364_v27 = vadd.f32 %v363_v18, %v301_v57  ;;  %v243_v28 = vadd.s32 %v531_v7, %v225_v50  ;;  %v259_v50 = vld [vmem:[#allocation2 + $0x58] sm:$0xff] }
  0x37   :  { %v305_v29 = vsel %vm289_vm7, %v255_v14, 0.0  ;;  %v321_v30 = vsel %vm289_vm7, %v271_v15, 0.0  ;;  %v380_v31 = vadd.f32 %v379_v22, %v317_v58  ;;  %vm291_vm9 = vcmp.lt.s32.totalorder %v241_v1, 2048  ;;  %v278_v14 = vld [vmem:[#allocation5 + $0x70] sm:$0xff] }
  0x38   :  { %v336_v34 = vmul.f32 %v320_v21, %v304_v20  ;;  %v349_v35 = vadd.f32 %v348_v26, %v334_v16  ;;  %v365_v36 = vadd.f32 %v364_v27, %v302_v2  ;;  %v244_v37 = vadd.s32 %v531_v7, %v226_v55 }
  0x39   :  { %v306_v38 = vsel %vm290_vm8, %v256_v23, 0.0  ;;  %v322_v39 = vsel %vm290_vm8, %v272_v24, 0.0  ;;  %v381_v40 = vadd.f32 %v380_v31, %v318_v3  ;;  %vm292_vm10 = vcmp.lt.s32.totalorder %v242_v10, 2048 }
  0x3a   :  { %v337_v43 = vmul.f32 %v321_v30, %v305_v29  ;;  %v350_v44 = vadd.f32 %v349_v35, %v335_v25  ;;  %v366_v45 = vadd.f32 %v365_v36, %v303_v11  ;;  %v245_v46 = vadd.s32 %v531_v7, %v227_v59  ;;  %v276_v59 = vld [vmem:[#allocation5 + $0x60] sm:$0xff] }
  0x3b   :  { %v307_v47 = vsel %vm291_vm9, %v257_v33, 0.0  ;;  %v323_v48 = vsel %vm291_vm9, %v273_v32, 0.0  ;;  %v382_v49 = vadd.f32 %v381_v40, %v319_v12  ;;  %vm293_vm11 = vcmp.lt.s32.totalorder %v243_v28, 2048 }
  0x3c   :  { %v338_v52 = vmul.f32 %v322_v39, %v306_v38  ;;  %v351_v53 = vadd.f32 %v350_v44, %v336_v34  ;;  %v367_v54 = vadd.f32 %v366_v45, %v304_v20  ;;  %v246_v55 = vadd.s32 %v531_v7, %v228_v0  ;;  %v277_v0 = vld [vmem:[#allocation5 + $0x68] sm:$0xff]  ;;  %v263_v20 = vld [vmem:[#allocation2 + $0x78] sm:$0xff] }
  0x3d   :  { %v308_v56 = vsel %vm292_vm10, %v258_v41, 0.0  ;;  %v324_v57 = vsel %vm292_vm10, %v274_v42, 0.0  ;;  %v383_v58 = vadd.f32 %v382_v49, %v320_v21  ;;  %vm294_vm12 = vcmp.lt.s32.totalorder %v244_v37, 2048  ;;  %v279_v21 = vld [vmem:[#allocation5 + $0x78] sm:$0xff] }
  0x3e   :  { %v339_v61 = vmul.f32 %v323_v48, %v307_v47  ;;  %v352_v62 = vadd.f32 %v351_v53, %v337_v43  ;;  %v368_v63 = vadd.f32 %v367_v54, %v305_v29  ;;  %v247_v1 = vadd.s32 %v531_v7, %v229_v19 }
  0x3f   :  { %v309_v2 = vsel %vm293_vm11, %v259_v50, 0.0  ;;  %v325_v3 = vsel %vm293_vm11, %v275_v51, 0.0  ;;  %v384_v4 = vadd.f32 %v383_v58, %v321_v30  ;;  %vm295_vm13 = vcmp.lt.s32.totalorder %v245_v46, 2048 }
  0x40   :  { %v340_v6 = vmul.f32 %v324_v57, %v308_v56  ;;  %v353_v8 = vadd.f32 %v352_v62, %v338_v52  ;;  %v369_v9 = vadd.f32 %v368_v63, %v306_v38  ;;  %v310_v10 = vsel %vm294_vm12, %v260_v60, 0.0 }
  0x41   :  { %v326_v11 = vsel %vm294_vm12, %v276_v59, 0.0  ;;  %v385_v12 = vadd.f32 %v384_v4, %v322_v39  ;;  %vm296_vm14 = vcmp.lt.s32.totalorder %v246_v55, 2048  ;;  %v341_v15 = vmul.f32 %v325_v3, %v309_v2 }
  0x42   :  { %v354_v16 = vadd.f32 %v353_v8, %v339_v61  ;;  %v370_v7 = vadd.f32 %v369_v9, %v307_v47  ;;  %v311_v17 = vsel %vm295_vm13, %v261_v5, 0.0  ;;  %v327_v18 = vsel %vm295_vm13, %v277_v0, 0.0 }
  0x43   :  { %v386_v19 = vadd.f32 %v385_v12, %v323_v48  ;;  %vm297_vm15 = vcmp.lt.s32.totalorder %v247_v1, 2048  ;;  %v342_v22 = vmul.f32 %v326_v11, %v310_v10  ;;  %v312_v25 = vsel %vm296_vm14, %v262_v13, 0.0 }
  0x44   :  { %v355_v23 = vadd.f32 %v354_v16, %v340_v6  ;;  %v371_v24 = vadd.f32 %v370_v7, %v308_v56  ;;  %v328_v26 = vsel %vm296_vm14, %v278_v14, 0.0  ;;  %v343_v28 = vmul.f32 %v327_v18, %v311_v17 }
  0x45   :  { %v387_v27 = vadd.f32 %v386_v19, %v324_v57  ;;  %v313_v31 = vsel %vm297_vm15, %v263_v20, 0.0  ;;  %v329_v33 = vsel %vm297_vm15, %v279_v21, 0.0  ;;  %v344_v34 = vmul.f32 %v328_v26, %v312_v25 }
  0x46   :  { %v356_v29 = vadd.f32 %v355_v23, %v341_v15  ;;  %v372_v30 = vadd.f32 %v371_v24, %v309_v2  ;;  %v345_v38 = vmul.f32 %v329_v33, %v313_v31 }
  0x47   :  { %v388_v32 = vadd.f32 %v387_v27, %v325_v3 }
  0x48   :  { %v357_v35 = vadd.f32 %v356_v29, %v342_v22  ;;  %v373_v36 = vadd.f32 %v372_v30, %v310_v10 }
  0x49   :  { %v389_v37 = vadd.f32 %v388_v32, %v326_v11 }
  0x4a   :  { %v358_v39 = vadd.f32 %v357_v35, %v343_v28  ;;  %v374_v40 = vadd.f32 %v373_v36, %v311_v17 }
  0x4b   :  { %v390_v41 = vadd.f32 %v389_v37, %v327_v18 }
  0x4c   :  { %v359_v42 = vadd.f32 %v358_v39, %v344_v34  ;;  %v375_v43 = vadd.f32 %v374_v40, %v312_v25 }
  0x4d   :  { %v391_v44 = vadd.f32 %v390_v41, %v328_v26 }
  0x4e   :  { %v360_v45 = vadd.f32 %v359_v42, %v345_v38  ;;  %v376_v46 = vadd.f32 %v375_v43, %v313_v31 }
  0x4f   :  { %v392_v47 = vadd.f32 %v391_v44, %v329_v33 }
  0x50   :  { %396 = vst [vmem:[#allocation7] sm:$0xff] %v360_v45  ;;  %400 = vst [vmem:[#allocation7 + $0x8] sm:$0xff] %v376_v46 }
  0x51   :  { %404 = vst [vmem:[#allocation7 + $0x10] sm:$0xff] %v392_v47 }
  0x52   :  { %484 = shalt.err (!%p481_p0)
}
  0x53   :  { %416 = dma.vmem_to_hbm [thread:$0]  %s411_s1, 384, %s586_s2, [#allocation4], %s500_s13, %s500_s13, %s501_s14  }
  0x54   :  { %497 = dma.done.wait [#allocation4], 384  }
  0x55   :  { %498 = vsyncadd [#allocation4], 4294966912 }
  0x56   :  { %420 = vsyncpa [#allocation3], 1 }
  0x57   :  { %421 = vsyncpa [#allocation6], 1 }
  0x58   :  { %422 = vsyncpa [#allocation4], 1 }

</bundles_post_ra>
